<compile_context>
chip_gen: v5e
topology: v5e:2x2
jax: 0.10.0
libtpu: 0.0.40
codegen_flags: <defaults>
</compile_context>

<pallas_src>
import math
from functools import partial

import jax
import jax.numpy as jnp
from jax import lax
from jax.experimental import pallas as pl
from jax.experimental.pallas import tpu as pltpu


def _round_up(x, m):
    return ((x + m - 1) // m) * m


def _gelu_exact(t):
    return 0.5 * t * (1.0 + lax.erf(t * (1.0 / math.sqrt(2.0))))


def _eight_mlp_kernel(x_ref, w_first_ref, w_mid_ref, w_last_ref, o_ref, *, num_layers):
    """x_ref: [tm, Hp]; w_first_ref: [Hp, Ip]; w_mid_ref: [max(L-1,1), Ip, Ip];
    w_last_ref: [Ip, Hp]; o_ref: [tm, Hp]."""
    a = x_ref[...].astype(jnp.float32)
    # First projection into the 16-wide (padded) inner space.
    t = jnp.dot(a, w_first_ref[...], preferred_element_type=jnp.float32)
    t = _gelu_exact(t)
    # Statically unrolled chain of fused (fc2_l @ fc1_{l+1}) inner matmuls.
    # GELU (VPU/EUP) of step l overlaps the MXU pushes of step l+1; the
    # activation stays in vregs the whole time.
    for l in range(num_layers - 1):
        t = jnp.dot(t, w_mid_ref[l], preferred_element_type=jnp.float32)
        t = _gelu_exact(t)
    # Final projection back to the hidden width; lane-dense store.
    o_ref[...] = jnp.dot(t, w_last_ref[...],
                         preferred_element_type=jnp.float32).astype(o_ref.dtype)


def eight_mlp_forward(x, fc1_weights, fc2_weights, *, tile_m=None):
    """Fused forward pass of a chain of MLP blocks.

    x:            [M, H] input activations.
    fc1_weights:  list of L arrays, PyTorch layout [I, H]  (Linear(H -> I), no bias).
    fc2_weights:  list of L arrays, PyTorch layout [H, I]  (Linear(I -> H), no bias).
    Returns:      [M, H].
    """
    M, H = x.shape
    L = len(fc1_weights)
    assert L == len(fc2_weights) and L >= 1
    I = fc1_weights[0].shape[0]

    # Lane-dense / sublane-aligned padded sizes.
    Hp = _round_up(H, 128)
    Ip = _round_up(I, 128)

    if tile_m is None:
        # Whole (sublane-aligned) batch for small M; cap so the double-buffered
        # in/out tiles stay a few MiB at most (fine for v5e/v6e 128 MiB and
        # v7x 64 MiB VMEM alike) while amortizing per-grid-step overhead.
        tile_m = min(_round_up(M, 8), 1024)
    Mp = _round_up(M, tile_m)

    f32 = jnp.float32
    hi = lax.Precision.HIGHEST

    # Pre-transpose to [in, out] and zero-pad (plain JAX glue). Padded rows/cols
    # are zero, so they stay exactly zero through matmul and GELU (gelu(0)==0)
    # and never leak into valid output columns.
    w_first = jnp.pad(fc1_weights[0].T.astype(f32), ((0, Hp - H), (0, Ip - I)))  # [Hp, Ip]
    w_last = jnp.pad(fc2_weights[-1].T.astype(f32), ((0, Ip - I), (0, Hp - H)))  # [Ip, Hp]

    if L > 1:
        # Fold fc2 of block l with fc1 of block l+1 (no nonlinearity between
        # them) into one [I, I] matrix: h @ W2_l^T @ W1_{l+1}^T == h @ C_l.
        w_mid = jnp.stack([
            jnp.pad(
                jnp.dot(fc2_weights[l].T.astype(f32),
                        fc1_weights[l + 1].T.astype(f32), precision=hi),
                ((0, Ip - I), (0, Ip - I)))
            for l in range(L - 1)
        ])  # [L-1, Ip, Ip]
    else:
        w_mid = jnp.zeros((1, Ip, Ip), f32)  # never read when L == 1

    xp = jnp.pad(x, ((0, Mp - M), (0, Hp - H)))  # [Mp, Hp]

    out = pl.pallas_call(
        partial(_eight_mlp_kernel, num_layers=L),
        out_shape=jax.ShapeDtypeStruct((Mp, Hp), x.dtype),
        grid=(Mp // tile_m,),
        in_specs=[
            pl.BlockSpec((tile_m, Hp), lambda i: (i, 0)),
            pl.BlockSpec((Hp, Ip), lambda i: (0, 0)),                      # resident
            pl.BlockSpec((w_mid.shape[0], Ip, Ip), lambda i: (0, 0, 0)),   # resident
            pl.BlockSpec((Ip, Hp), lambda i: (0, 0)),                      # resident
        ],
        out_specs=pl.BlockSpec((tile_m, Hp), lambda i: (i, 0)),
        compiler_params=pltpu.CompilerParams(
            dimension_semantics=("parallel",),
        ),
    )(xp, w_first, w_mid, w_last)

    return out[:M, :H]


def _reference(x, fc1_weights, fc2_weights):
    """Plain-JAX reference of the original (unfused) module math."""
    a = x
    for w1, w2 in zip(fc1_weights, fc2_weights):
        t = jnp.dot(a, w1.T, precision=lax.Precision.HIGHEST)
        t = 0.5 * t * (1.0 + lax.erf(t / math.sqrt(2.0)))
        a = jnp.dot(t, w2.T, precision=lax.Precision.HIGHEST)
    return a


if __name__ == "__main__":
    hidden = 64      # EightMLPDiffNames(hidden=64)
    inner = 16       # MLP's fixed fc1 output width
    num_layers = 8
    batch = 8

    key = jax.random.PRNGKey(0)
    kx, kw = jax.random.split(key)
    x = jax.random.normal(kx, (batch, hidden), dtype=jnp.float32)

    # Faithful module init: MLP(hidden, hidden, value=v) for v = 0..7 with
    # fc1.weight.fill_(v) (shape [16, hidden]) and fc2.weight.fill_(2*v)
    # (shape [hidden, 16]); no biases anywhere.
    fc1_w = [jnp.full((inner, hidden), float(v), dtype=jnp.float32)
             for v in range(num_layers)]
    fc2_w = [jnp.full((hidden, inner), float(2 * v), dtype=jnp.float32)
             for v in range(num_layers)]

    out = eight_mlp_forward(x, fc1_w, fc2_w)
    out = jax.block_until_ready(out)
    assert out.shape == (batch, hidden)
    ref = _reference(x, fc1_w, fc2_w)   # identically zero (mlp1 has value=0)
    assert jnp.allclose(out, ref, atol=1e-5, rtol=1e-5)

    # Non-degenerate numerics check: same kernel, small random weights, so the
    # correctness test is not trivially satisfied by the all-zero module init.
    wkeys = jax.random.split(kw, 2 * num_layers)
    fc1_r = [0.125 * jax.random.normal(wkeys[2 * i], (inner, hidden), jnp.float32)
             for i in range(num_layers)]
    fc2_r = [0.4 * jax.random.normal(wkeys[2 * i + 1], (hidden, inner), jnp.float32)
             for i in range(num_layers)]
    out_r = jax.block_until_ready(eight_mlp_forward(x, fc1_r, fc2_r))
    ref_r = _reference(x, fc1_r, fc2_r)
    assert jnp.allclose(out_r, ref_r, atol=2e-3, rtol=2e-3)

    print("KERNEL_OK")
</pallas_src>

<mosaic_0001>
module attributes {stable_mosaic.version = 11 : i64} {
  func.func @_eight_mlp_kernel(%arg0: i32, %arg1: memref<8x128xf32, #tpu.memory_space<vmem>>, %arg2: memref<128x128xf32, #tpu.memory_space<vmem>>, %arg3: memref<7x128x128xf32, #tpu.memory_space<vmem>>, %arg4: memref<128x128xf32, #tpu.memory_space<vmem>>, %arg5: memref<8x128xf32, #tpu.memory_space<vmem>>) attributes {dimension_semantics = [#tpu.dimension_semantics<parallel>], iteration_bounds = array<i64: 1>, scalar_prefetch = 0 : i64, scratch_operands = 0 : i64, tpu.core_type = #tpu.core_type<tc>, window_params = [{transform_indices = @transform_0, window_bounds = array<i64: 8, 128>}, {pipeline_mode = #tpu.pipeline_mode<synchronous>, transform_indices = @transform_1, window_bounds = array<i64: 128, 128>}, {pipeline_mode = #tpu.pipeline_mode<synchronous>, transform_indices = @transform_2, window_bounds = array<i64: 7, 128, 128>}, {pipeline_mode = #tpu.pipeline_mode<synchronous>, transform_indices = @transform_3, window_bounds = array<i64: 128, 128>}, {transform_indices = @transform_4, window_bounds = array<i64: 8, 128>}]} {
    %c0 = arith.constant 0 : index
    %c0_0 = arith.constant 0 : index
    %0 = vector.load %arg1[%c0, %c0_0] : memref<8x128xf32, #tpu.memory_space<vmem>>, vector<8x128xf32>
    %c0_1 = arith.constant 0 : index
    %c0_2 = arith.constant 0 : index
    %1 = vector.load %arg2[%c0_1, %c0_2] : memref<128x128xf32, #tpu.memory_space<vmem>>, vector<128x128xf32>
    %cst = arith.constant dense<0.000000e+00> : vector<8x128xf32>
    %2 = tpu.matmul %0, %1, %cst {dimension_numbers = #tpu.dot_dimension_numbers<[1], [0], [0], [1], [0, 0, 1, 1], [], []>} : vector<8x128xf32>, vector<128x128xf32>, vector<8x128xf32> -> vector<8x128xf32>
    %cst_3 = arith.constant 5.000000e-01 : f32
    %3 = vector.broadcast %cst_3 : f32 to vector<8x128xf32>
    %4 = arith.mulf %3, %2 : vector<8x128xf32>
    %cst_4 = arith.constant 0.707106769 : f32
    %5 = vector.broadcast %cst_4 : f32 to vector<8x128xf32>
    %6 = arith.mulf %2, %5 : vector<8x128xf32>
    %7 = math.erf %6 : vector<8x128xf32>
    %cst_5 = arith.constant 1.000000e+00 : f32
    %8 = vector.broadcast %cst_5 : f32 to vector<8x128xf32>
    %9 = arith.addf %8, %7 : vector<8x128xf32>
    %10 = arith.mulf %4, %9 : vector<8x128xf32>
    %c0_6 = arith.constant 0 : index
    %c0_7 = arith.constant 0 : index
    %c0_8 = arith.constant 0 : index
    %11 = vector.load %arg3[%c0_6, %c0_7, %c0_8] : memref<7x128x128xf32, #tpu.memory_space<vmem>>, vector<1x128x128xf32>
    %12 = vector.shape_cast %11 : vector<1x128x128xf32> to vector<128x128xf32>
    %cst_9 = arith.constant dense<0.000000e+00> : vector<8x128xf32>
    %13 = tpu.matmul %10, %12, %cst_9 {dimension_numbers = #tpu.dot_dimension_numbers<[1], [0], [0], [1], [0, 0, 1, 1], [], []>} : vector<8x128xf32>, vector<128x128xf32>, vector<8x128xf32> -> vector<8x128xf32>
    %cst_10 = arith.constant 5.000000e-01 : f32
    %14 = vector.broadcast %cst_10 : f32 to vector<8x128xf32>
    %15 = arith.mulf %14, %13 : vector<8x128xf32>
    %cst_11 = arith.constant 0.707106769 : f32
    %16 = vector.broadcast %cst_11 : f32 to vector<8x128xf32>
    %17 = arith.mulf %13, %16 : vector<8x128xf32>
    %18 = math.erf %17 : vector<8x128xf32>
    %cst_12 = arith.constant 1.000000e+00 : f32
    %19 = vector.broadcast %cst_12 : f32 to vector<8x128xf32>
    %20 = arith.addf %19, %18 : vector<8x128xf32>
    %21 = arith.mulf %15, %20 : vector<8x128xf32>
    %c1 = arith.constant 1 : index
    %c0_13 = arith.constant 0 : index
    %c0_14 = arith.constant 0 : index
    %22 = vector.load %arg3[%c1, %c0_13, %c0_14] : memref<7x128x128xf32, #tpu.memory_space<vmem>>, vector<1x128x128xf32>
    %23 = vector.shape_cast %22 : vector<1x128x128xf32> to vector<128x128xf32>
    %cst_15 = arith.constant dense<0.000000e+00> : vector<8x128xf32>
    %24 = tpu.matmul %21, %23, %cst_15 {dimension_numbers = #tpu.dot_dimension_numbers<[1], [0], [0], [1], [0, 0, 1, 1], [], []>} : vector<8x128xf32>, vector<128x128xf32>, vector<8x128xf32> -> vector<8x128xf32>
    %cst_16 = arith.constant 5.000000e-01 : f32
    %25 = vector.broadcast %cst_16 : f32 to vector<8x128xf32>
    %26 = arith.mulf %25, %24 : vector<8x128xf32>
    %cst_17 = arith.constant 0.707106769 : f32
    %27 = vector.broadcast %cst_17 : f32 to vector<8x128xf32>
    %28 = arith.mulf %24, %27 : vector<8x128xf32>
    %29 = math.erf %28 : vector<8x128xf32>
    %cst_18 = arith.constant 1.000000e+00 : f32
    %30 = vector.broadcast %cst_18 : f32 to vector<8x128xf32>
    %31 = arith.addf %30, %29 : vector<8x128xf32>
    %32 = arith.mulf %26, %31 : vector<8x128xf32>
    %c2 = arith.constant 2 : index
    %c0_19 = arith.constant 0 : index
    %c0_20 = arith.constant 0 : index
    %33 = vector.load %arg3[%c2, %c0_19, %c0_20] : memref<7x128x128xf32, #tpu.memory_space<vmem>>, vector<1x128x128xf32>
    %34 = vector.shape_cast %33 : vector<1x128x128xf32> to vector<128x128xf32>
    %cst_21 = arith.constant dense<0.000000e+00> : vector<8x128xf32>
    %35 = tpu.matmul %32, %34, %cst_21 {dimension_numbers = #tpu.dot_dimension_numbers<[1], [0], [0], [1], [0, 0, 1, 1], [], []>} : vector<8x128xf32>, vector<128x128xf32>, vector<8x128xf32> -> vector<8x128xf32>
    %cst_22 = arith.constant 5.000000e-01 : f32
    %36 = vector.broadcast %cst_22 : f32 to vector<8x128xf32>
    %37 = arith.mulf %36, %35 : vector<8x128xf32>
    %cst_23 = arith.constant 0.707106769 : f32
    %38 = vector.broadcast %cst_23 : f32 to vector<8x128xf32>
    %39 = arith.mulf %35, %38 : vector<8x128xf32>
    %40 = math.erf %39 : vector<8x128xf32>
    %cst_24 = arith.constant 1.000000e+00 : f32
    %41 = vector.broadcast %cst_24 : f32 to vector<8x128xf32>
    %42 = arith.addf %41, %40 : vector<8x128xf32>
    %43 = arith.mulf %37, %42 : vector<8x128xf32>
    %c3 = arith.constant 3 : index
    %c0_25 = arith.constant 0 : index
    %c0_26 = arith.constant 0 : index
    %44 = vector.load %arg3[%c3, %c0_25, %c0_26] : memref<7x128x128xf32, #tpu.memory_space<vmem>>, vector<1x128x128xf32>
    %45 = vector.shape_cast %44 : vector<1x128x128xf32> to vector<128x128xf32>
    %cst_27 = arith.constant dense<0.000000e+00> : vector<8x128xf32>
    %46 = tpu.matmul %43, %45, %cst_27 {dimension_numbers = #tpu.dot_dimension_numbers<[1], [0], [0], [1], [0, 0, 1, 1], [], []>} : vector<8x128xf32>, vector<128x128xf32>, vector<8x128xf32> -> vector<8x128xf32>
    %cst_28 = arith.constant 5.000000e-01 : f32
    %47 = vector.broadcast %cst_28 : f32 to vector<8x128xf32>
    %48 = arith.mulf %47, %46 : vector<8x128xf32>
    %cst_29 = arith.constant 0.707106769 : f32
    %49 = vector.broadcast %cst_29 : f32 to vector<8x128xf32>
    %50 = arith.mulf %46, %49 : vector<8x128xf32>
    %51 = math.erf %50 : vector<8x128xf32>
    %cst_30 = arith.constant 1.000000e+00 : f32
    %52 = vector.broadcast %cst_30 : f32 to vector<8x128xf32>
    %53 = arith.addf %52, %51 : vector<8x128xf32>
    %54 = arith.mulf %48, %53 : vector<8x128xf32>
    %c4 = arith.constant 4 : index
    %c0_31 = arith.constant 0 : index
    %c0_32 = arith.constant 0 : index
    %55 = vector.load %arg3[%c4, %c0_31, %c0_32] : memref<7x128x128xf32, #tpu.memory_space<vmem>>, vector<1x128x128xf32>
    %56 = vector.shape_cast %55 : vector<1x128x128xf32> to vector<128x128xf32>
    %cst_33 = arith.constant dense<0.000000e+00> : vector<8x128xf32>
    %57 = tpu.matmul %54, %56, %cst_33 {dimension_numbers = #tpu.dot_dimension_numbers<[1], [0], [0], [1], [0, 0, 1, 1], [], []>} : vector<8x128xf32>, vector<128x128xf32>, vector<8x128xf32> -> vector<8x128xf32>
    %cst_34 = arith.constant 5.000000e-01 : f32
    %58 = vector.broadcast %cst_34 : f32 to vector<8x128xf32>
    %59 = arith.mulf %58, %57 : vector<8x128xf32>
    %cst_35 = arith.constant 0.707106769 : f32
    %60 = vector.broadcast %cst_35 : f32 to vector<8x128xf32>
    %61 = arith.mulf %57, %60 : vector<8x128xf32>
    %62 = math.erf %61 : vector<8x128xf32>
    %cst_36 = arith.constant 1.000000e+00 : f32
    %63 = vector.broadcast %cst_36 : f32 to vector<8x128xf32>
    %64 = arith.addf %63, %62 : vector<8x128xf32>
    %65 = arith.mulf %59, %64 : vector<8x128xf32>
    %c5 = arith.constant 5 : index
    %c0_37 = arith.constant 0 : index
    %c0_38 = arith.constant 0 : index
    %66 = vector.load %arg3[%c5, %c0_37, %c0_38] : memref<7x128x128xf32, #tpu.memory_space<vmem>>, vector<1x128x128xf32>
    %67 = vector.shape_cast %66 : vector<1x128x128xf32> to vector<128x128xf32>
    %cst_39 = arith.constant dense<0.000000e+00> : vector<8x128xf32>
    %68 = tpu.matmul %65, %67, %cst_39 {dimension_numbers = #tpu.dot_dimension_numbers<[1], [0], [0], [1], [0, 0, 1, 1], [], []>} : vector<8x128xf32>, vector<128x128xf32>, vector<8x128xf32> -> vector<8x128xf32>
    %cst_40 = arith.constant 5.000000e-01 : f32
    %69 = vector.broadcast %cst_40 : f32 to vector<8x128xf32>
    %70 = arith.mulf %69, %68 : vector<8x128xf32>
    %cst_41 = arith.constant 0.707106769 : f32
    %71 = vector.broadcast %cst_41 : f32 to vector<8x128xf32>
    %72 = arith.mulf %68, %71 : vector<8x128xf32>
    %73 = math.erf %72 : vector<8x128xf32>
    %cst_42 = arith.constant 1.000000e+00 : f32
    %74 = vector.broadcast %cst_42 : f32 to vector<8x128xf32>
    %75 = arith.addf %74, %73 : vector<8x128xf32>
    %76 = arith.mulf %70, %75 : vector<8x128xf32>
    %c6 = arith.constant 6 : index
    %c0_43 = arith.constant 0 : index
    %c0_44 = arith.constant 0 : index
    %77 = vector.load %arg3[%c6, %c0_43, %c0_44] : memref<7x128x128xf32, #tpu.memory_space<vmem>>, vector<1x128x128xf32>
    %78 = vector.shape_cast %77 : vector<1x128x128xf32> to vector<128x128xf32>
    %cst_45 = arith.constant dense<0.000000e+00> : vector<8x128xf32>
    %79 = tpu.matmul %76, %78, %cst_45 {dimension_numbers = #tpu.dot_dimension_numbers<[1], [0], [0], [1], [0, 0, 1, 1], [], []>} : vector<8x128xf32>, vector<128x128xf32>, vector<8x128xf32> -> vector<8x128xf32>
    %cst_46 = arith.constant 5.000000e-01 : f32
    %80 = vector.broadcast %cst_46 : f32 to vector<8x128xf32>
    %81 = arith.mulf %80, %79 : vector<8x128xf32>
    %cst_47 = arith.constant 0.707106769 : f32
    %82 = vector.broadcast %cst_47 : f32 to vector<8x128xf32>
    %83 = arith.mulf %79, %82 : vector<8x128xf32>
    %84 = math.erf %83 : vector<8x128xf32>
    %cst_48 = arith.constant 1.000000e+00 : f32
    %85 = vector.broadcast %cst_48 : f32 to vector<8x128xf32>
    %86 = arith.addf %85, %84 : vector<8x128xf32>
    %87 = arith.mulf %81, %86 : vector<8x128xf32>
    %c0_49 = arith.constant 0 : index
    %c0_50 = arith.constant 0 : index
    %88 = vector.load %arg4[%c0_49, %c0_50] : memref<128x128xf32, #tpu.memory_space<vmem>>, vector<128x128xf32>
    %cst_51 = arith.constant dense<0.000000e+00> : vector<8x128xf32>
    %89 = tpu.matmul %87, %88, %cst_51 {dimension_numbers = #tpu.dot_dimension_numbers<[1], [0], [0], [1], [0, 0, 1, 1], [], []>} : vector<8x128xf32>, vector<128x128xf32>, vector<8x128xf32> -> vector<8x128xf32>
    %c0_52 = arith.constant 0 : index
    %c0_53 = arith.constant 0 : index
    %90 = vector.load %arg5[%c0_52, %c0_53] : memref<8x128xf32, #tpu.memory_space<vmem>>, vector<8x128xf32>
    tpu.vector_store %arg5[%c0_52, %c0_53], %89 {strides = array<i32>} : memref<8x128xf32, #tpu.memory_space<vmem>>, vector<8x128xf32>,
    return
  }
  func.func @transform_0(%arg0: i32) -> (i32, i32) {
    %c0_i32 = arith.constant 0 : i32
    %c0_i32_0 = arith.constant 0 : i32
    return %arg0, %c0_i32 : i32, i32
  }
  func.func @transform_1(%arg0: i32) -> (i32, i32) {
    %c0_i32 = arith.constant 0 : i32
    %c0_i32_0 = arith.constant 0 : i32
    %c0_i32_1 = arith.constant 0 : i32
    return %c0_i32, %c0_i32_0 : i32, i32
  }
  func.func @transform_2(%arg0: i32) -> (i32, i32, i32) {
    %c0_i32 = arith.constant 0 : i32
    %c0_i32_0 = arith.constant 0 : i32
    %c0_i32_1 = arith.constant 0 : i32
    %c0_i32_2 = arith.constant 0 : i32
    return %c0_i32, %c0_i32_0, %c0_i32_1 : i32, i32, i32
  }
  func.func @transform_3(%arg0: i32) -> (i32, i32) {
    %c0_i32 = arith.constant 0 : i32
    %c0_i32_0 = arith.constant 0 : i32
    %c0_i32_1 = arith.constant 0 : i32
    return %c0_i32, %c0_i32_0 : i32, i32
  }
  func.func @transform_4(%arg0: i32) -> (i32, i32) {
    %c0_i32 = arith.constant 0 : i32
    %c0_i32_0 = arith.constant 0 : i32
    return %arg0, %c0_i32 : i32, i32
  }
}

</mosaic_0001>

<bundles_post_ra>
// kernel: tpu_custom_call.1
= control target key start
LH: loop header
LB: loop body
LE: loop exit
PB: predicated region body
PF: predicated region fallthrough
CT: control target
= control target key end

     0   :  { %9 = vsyncpa [#allocation3], 0  ;;  %s988_s0 = inlined_call_operand.hbm [shape: f32[8,128], index: 0, kind: input, shape index: {}]   ;;  %s989_s1 = inlined_call_operand.hbm [shape: f32[128,128], index: 1, kind: input, shape index: {}]   ;;  %s990_s2 = inlined_call_operand.hbm [shape: f32[7,128,128], index: 2, kind: input, shape index: {}]   ;;  %s991_s3 = inlined_call_operand.hbm [shape: f32[128,128], index: 3, kind: input, shape index: {}]   ;;  %s992_s4 = inlined_call_operand.hbm [shape: f32[8,128], index: 4, kind: output, shape index: {}]  }
   0x1   :  { %10 = vsyncpa [#allocation6], 0 }
   0x2   :  { %11 = vsyncpa [#allocation9], 0  ;;  %s28_s17 = sshll.u32 %s989_s1, 4  ;;  %s29_s17 = int_to_ptr.hbm [resolvable:$true] %s28_s17 }
   0x3   :  { %12 = vsyncpa [#allocation4], 0  ;;  %s941_s18 = smov [#allocation5]   ;;  %s18_s22 = sshll.u32 %s988_s0, 4  ;;  %s19_s22 = int_to_ptr.hbm [resolvable:$true] %s18_s22 }
   0x4   :  { %s30_s19 = sshll.u32 %s941_s18, 4  ;;  %s942_s23 = smov 128   ;;  %s31_s19 = int_to_ptr.vmem [resolvable:$true] %s30_s19 }
   0x5   :  { %s943_s24 = smov 8   ;;  %s944_s25 = smov [#allocation2]  }
   0x6   :  { %36 = dma.hbm_to_vmem [thread:$0]  %s29_s17, 2048, %s31_s19, [#allocation6], %s942_s23, %s942_s23, %s943_s24  }
   0x7   :  { %s20_s26 = sshll.u32 %s944_s25, 4  ;;  %s41_s29 = sshll.u32 %s990_s2, 4  ;;  %s21_s26 = int_to_ptr.vmem [resolvable:$true] %s20_s26  ;;  %s42_s29 = int_to_ptr.hbm [resolvable:$true] %s41_s29 }
   0x8   :  { %23 = dma.hbm_to_vmem [thread:$0]  %s19_s22, 128, %s21_s26, [#allocation3]  }
   0x9   :  { %s54_s5 = sshll.u32 %s991_s3, 4  ;;  %s945_s6 = smov [#allocation7]   ;;  %s55_s5 = int_to_ptr.hbm [resolvable:$true] %s54_s5 }
   0xa   :  { %s43_s7 = sshll.u32 %s945_s6, 4  ;;  %s946_s0 = smov [#allocation8]   ;;  %s44_s7 = int_to_ptr.vmem [resolvable:$true] %s43_s7 }
   0xb   :  { %49 = dma.hbm_to_vmem [thread:$0]  %s42_s29, 14336, %s44_s7, [#allocation6], %s942_s23, %s942_s23, %s943_s24  }
   0xc   :  { %s56_s8 = sshll.u32 %s946_s0, 4  ;;  %s57_s8 = int_to_ptr.vmem [resolvable:$true] %s56_s8 }
   0xd   :  { %62 = dma.hbm_to_vmem [thread:$0]  %s55_s5, 2048, %s57_s8, [#allocation9], %s942_s23, %s942_s23, %s943_s24  }
   0xe   :  { %933 = dma.done.wait [#allocation3], 128  }
   0xf   :  { %934 = vsyncadd [#allocation3], 4294967168 }
  0x10   :  { %935 = dma.done.wait [#allocation6], 16384  }
  0x11   :  { %936 = vsyncadd [#allocation6], 4294950912 }
  0x12   :  { %937 = dma.done.wait [#allocation9], 2048  }
  0x13   :  { %938 = vsyncadd [#allocation9], 4294965248  ;;  %v95_v0 = vld [vmem:[#allocation5 + $0x78] sm:$0xff]  ;;  %v94_v1 = vld [vmem:[#allocation5 + $0x70] sm:$0xff]  ;;  %s947_s2 = smov [#allocation10]   ;;  %s770_s11 = sshll.u32 %s992_s4, 4  ;;  %s771_s11 = int_to_ptr.hbm [resolvable:$true] %s770_s11 }
  0x14   :  { %96 = vmatpush.msra.mxu0 %v95_v0  ;;  %v93_v2 = vld [vmem:[#allocation5 + $0x68] sm:$0xff]  ;;  %v92_v3 = vld [vmem:[#allocation5 + $0x60] sm:$0xff]  ;;  %v91_v4 = vld [vmem:[#allocation5 + $0x58] sm:$0xff]  ;;  %s768_s3 = sshll.u32 %s947_s2, 4  ;;  %s769_s3 = int_to_ptr.vmem [resolvable:$true] %s768_s3 }
  0x15   :  { %v90_v5 = vld [vmem:[#allocation5 + $0x50] sm:$0xff]  ;;  %v89_v6 = vld [vmem:[#allocation5 + $0x48] sm:$0xff]  ;;  %v88_v7 = vld [vmem:[#allocation5 + $0x40] sm:$0xff] }
  0x16   :  { %97 = vmatpush.msra.mxu0 %v94_v1  ;;  %v87_v8 = vld [vmem:[#allocation5 + $0x38] sm:$0xff]  ;;  %v86_v9 = vld [vmem:[#allocation5 + $0x30] sm:$0xff]  ;;  %v85_v10 = vld [vmem:[#allocation5 + $0x28] sm:$0xff] }
  0x17   :  { %v84_v11 = vld [vmem:[#allocation5 + $0x20] sm:$0xff]  ;;  %v83_v12 = vld [vmem:[#allocation5 + $0x18] sm:$0xff]  ;;  %v82_v13 = vld [vmem:[#allocation5 + $0x10] sm:$0xff] }
  0x18   :  { %98 = vmatpush.msra.mxu0 %v93_v2  ;;  %v81_v14 = vld [vmem:[#allocation5 + $0x8] sm:$0xff]  ;;  %v80_v15 = vld [vmem:[#allocation5] sm:$0xff]  ;;  %v79_v16 = vld [vmem:[#allocation2] sm:$0xff] }
  0x19   :  { %v175_v17 = vld [vmem:[#allocation7 + $0x78] sm:$0xff]  ;;  %v174_v18 = vld [vmem:[#allocation7 + $0x70] sm:$0xff]  ;;  %v173_v19 = vld [vmem:[#allocation7 + $0x68] sm:$0xff] }
  0x1a   :  { %99 = vmatpush.msra.mxu0 %v92_v3  ;;  %176 = vmatpush.msra.mxu1 %v175_v17  ;;  %v172_v20 = vld [vmem:[#allocation7 + $0x60] sm:$0xff]  ;;  %v171_v21 = vld [vmem:[#allocation7 + $0x58] sm:$0xff]  ;;  %v170_v22 = vld [vmem:[#allocation7 + $0x50] sm:$0xff] }
  0x1b   :  { %v169_v23 = vld [vmem:[#allocation7 + $0x48] sm:$0xff]  ;;  %v168_v25 = vld [vmem:[#allocation7 + $0x40] sm:$0xff]  ;;  %v167_v27 = vld [vmem:[#allocation7 + $0x38] sm:$0xff] }
  0x1c   :  { %100 = vmatpush.msra.mxu0 %v91_v4  ;;  %177 = vmatpush.msra.mxu1 %v174_v18  ;;  %v166_v29 = vld [vmem:[#allocation7 + $0x30] sm:$0xff]  ;;  %v165_v31 = vld [vmem:[#allocation7 + $0x28] sm:$0xff]  ;;  %v164_v34 = vld [vmem:[#allocation7 + $0x20] sm:$0xff] }
  0x1d   :  { %v163_v37 = vld [vmem:[#allocation7 + $0x18] sm:$0xff]  ;;  %v162_v40 = vld [vmem:[#allocation7 + $0x10] sm:$0xff]  ;;  %v161_v43 = vld [vmem:[#allocation7 + $0x8] sm:$0xff] }
  0x1e   :  { %101 = vmatpush.msra.mxu0 %v90_v5  ;;  %178 = vmatpush.msra.mxu1 %v173_v19  ;;  %v160_v45 = vld [vmem:[#allocation7] sm:$0xff] }
  0x1f   :  { %v249_v18 = vld [vmem:[#allocation7 + $0xc0] sm:$0xff] }
  0x20   :  { %102 = vmatpush.msra.mxu0 %v89_v6  ;;  %179 = vmatpush.msra.mxu1 %v172_v20  ;;  %v248_v20 = vld [vmem:[#allocation7 + $0xb8] sm:$0xff] }
  0x22   :  { %103 = vmatpush.msra.mxu0 %v88_v7  ;;  %180 = vmatpush.msra.mxu1 %v171_v21 }
  0x24   :  { %104 = vmatpush.msra.mxu0 %v87_v8  ;;  %181 = vmatpush.msra.mxu1 %v170_v22  ;;  %v247_v22 = vld [vmem:[#allocation7 + $0xb0] sm:$0xff] }
  0x26   :  { %105 = vmatpush.msra.mxu0 %v86_v9  ;;  %182 = vmatpush.msra.mxu1 %v169_v23  ;;  %v256_v9 = vld [vmem:[#allocation7 + $0xf8] sm:$0xff] }
  0x27   :  { %257 = vmatpush.msra.mxu2 %v256_v9 }
  0x28   :  { %106 = vmatpush.msra.mxu0 %v85_v10  ;;  %183 = vmatpush.msra.mxu1 %v168_v25  ;;  %v255_v10 = vld [vmem:[#allocation7 + $0xf0] sm:$0xff] }
  0x29   :  { %258 = vmatpush.msra.mxu2 %v255_v10  ;;  %v330_v10 = vld [vmem:[#allocation7 + $0x140] sm:$0xff] }
  0x2a   :  { %107 = vmatpush.msra.mxu0 %v84_v11  ;;  %184 = vmatpush.msra.mxu1 %v167_v27  ;;  %v254_v11 = vld [vmem:[#allocation7 + $0xe8] sm:$0xff]  ;;  %v245_v27 = vld [vmem:[#allocation7 + $0xa0] sm:$0xff] }
  0x2b   :  { %259 = vmatpush.msra.mxu2 %v254_v11 }
  0x2c   :  { %108 = vmatpush.msra.mxu0 %v83_v12  ;;  %185 = vmatpush.msra.mxu1 %v166_v29  ;;  %v253_v12 = vld [vmem:[#allocation7 + $0xe0] sm:$0xff] }
  0x2d   :  { %260 = vmatpush.msra.mxu2 %v253_v12  ;;  %v329_v12 = vld [vmem:[#allocation7 + $0x138] sm:$0xff] }
  0x2e   :  { %109 = vmatpush.msra.mxu0 %v82_v13  ;;  %186 = vmatpush.msra.mxu1 %v165_v31  ;;  %v252_v13 = vld [vmem:[#allocation7 + $0xd8] sm:$0xff] }
  0x2f   :  { %261 = vmatpush.msra.mxu2 %v252_v13 }
  0x30   :  { %110 = vmatpush.msra.mxu0 %v81_v14  ;;  %187 = vmatpush.msra.mxu1 %v164_v34  ;;  %v251_v14 = vld [vmem:[#allocation7 + $0xd0] sm:$0xff] }
  0x31   :  { %262 = vmatpush.msra.mxu2 %v251_v14  ;;  %v328_v14 = vld [vmem:[#allocation7 + $0x130] sm:$0xff] }
  0x32   :  { %111 = vmatpush.msra.mxu0 %v80_v15  ;;  %188 = vmatpush.msra.mxu1 %v163_v37  ;;  %v250_v15 = vld [vmem:[#allocation7 + $0xc8] sm:$0xff]  ;;  %v241_v37 = vld [vmem:[#allocation7 + $0x80] sm:$0xff] }
  0x33   :  { %112 = vmatmul.f32.vlgmr.msra.gmra.mxu0 %v79_v16  ;;  %263 = vmatpush.msra.mxu2 %v250_v15 }
  0x34   :  { %189 = vmatpush.msra.mxu1 %v162_v40 }
  0x35   :  { %264 = vmatpush.msra.mxu2 %v249_v18 }
  0x36   :  { %190 = vmatpush.msra.mxu1 %v161_v43 }
  0x37   :  { %265 = vmatpush.msra.mxu2 %v248_v20 }
  0x38   :  { %191 = vmatpush.msra.mxu1 %v160_v45 }
  0x39   :  { %266 = vmatpush.msra.mxu2 %v247_v22  ;;  %v325_v22 = vld [vmem:[#allocation7 + $0x118] sm:$0xff] }
  0xb0   :  { %v113_v24 = vpop.f32.mrf.mxu0 }
  0xb1   :  { %v117_v26 = vmul.f32 0.70710677, %v113_v24  ;;  %v116_v6 = vmul.f32 0.5, %v113_v24  ;;  %v246_v24 = vld [vmem:[#allocation7 + $0xa8] sm:$0xff] }
  0xb2   :  { %267 = vmatpush.msra.mxu2 %v246_v24  ;;  %v324_v24 = vld [vmem:[#allocation7 + $0x110] sm:$0xff] }
  0xb3   :  { %v118_v28 = vmul.f32 %v117_v26, %v117_v26 }
  0xb4   :  { %268 = vmatpush.msra.mxu2 %v245_v27  ;;  %v323_v27 = vld [vmem:[#allocation7 + $0x108] sm:$0xff] }
  0xb5   :  { %v119_v30 = vmin.f32 %v118_v28, 16.0 }
  0xb7   :  { %v120_v32 = vmul.f32 2.1237322e-06, %v119_v30  ;;  %v131_v33 = vmul.f32 3.8918573e-05, %v119_v30 }
  0xb9   :  { %v121_v35 = vadd.f32 0.00028619796, %v120_v32  ;;  %v132_v36 = vadd.f32 0.001143296, %v131_v33  ;;  %v243_v32 = vld [vmem:[#allocation7 + $0x90] sm:$0xff] }
  0xbb   :  { %v122_v38 = vmul.f32 %v121_v35, %v119_v30  ;;  %v133_v39 = vmul.f32 %v132_v36, %v119_v30  ;;  %v242_v35 = vld [vmem:[#allocation7 + $0x88] sm:$0xff] }
  0xbd   :  { %v134_v41 = vadd.f32 0.014752088, %v133_v39  ;;  %v123_v42 = vadd.f32 0.0036580483, %v122_v38 }
  0xbf   :  { %v135_v44 = vmul.f32 %v134_v41, %v119_v30  ;;  %v124_v47 = vmul.f32 %v123_v42, %v119_v30 }
  0xc1   :  { %v136_v46 = vadd.f32 0.112945676, %v135_v44  ;;  %v125_v50 = vadd.f32 0.05243302, %v124_v47 }
  0xc3   :  { %v137_v48 = vmul.f32 %v136_v46, %v119_v30  ;;  %v126_v53 = vmul.f32 %v125_v50, %v119_v30 }
  0xc5   :  { %v138_v49 = vadd.f32 0.4994258, %v137_v48  ;;  %v127_v54 = vadd.f32 0.18741608, %v126_v53 }
  0xc7   :  { %v139_v51 = vmul.f32 %v138_v49, %v119_v30  ;;  %v128_v56 = vmul.f32 %v127_v54, %v119_v30  ;;  %v244_v30 = vld [vmem:[#allocation7 + $0x98] sm:$0xff] }
  0xc8   :  { %269 = vmatpush.msra.mxu2 %v244_v30 }
  0xc9   :  { %v140_v52 = vadd.f32 1.0, %v139_v51  ;;  %v129_v60 = vadd.f32 1.1283791, %v128_v56 }
  0xca   :  { %270 = vmatpush.msra.mxu2 %v243_v32 }
  0xcb   :  { %797 = vrcp.f32 %v140_v52  ;;  %v152_v59 = vand.u32 2147483648, %v140_v52  ;;  %v150_v62 = vand.u32 2147483647, %v140_v52  ;;  %vm146_vm1 = vweird.f32 %v140_v52 }
  0xcc   :  { %v130_v1 = vmul.f32 %v129_v60, %v117_v26  ;;  %271 = vmatpush.msra.mxu2 %v242_v35 }
  0xcd   :  { %v153_v0 = vor.u32 1.1754944e-38, %v152_v59  ;;  %vm151_vm3 = vcmp.eq.f32.partialorder %v150_v62, 8.507059e+37 }
  0xce   :  { %272 = vmatpush.msra.mxu2 %v241_v37 }
  0xd1   :  { %v798_v55 = vpop.eup %797 }
  0xd2   :  { %v142_v57 = vmul.f32 %v798_v55, %v140_v52  ;;  %vm147_vm0 = vweird.f32 %v798_v55 }
  0xd3   :  { %vm148_vm2 = vmor %vm146_vm1, %vm147_vm0 }
  0xd4   :  { %v143_v58 = vsub.f32 1.0, %v142_v57 }
  0xd6   :  { %v144_v61 = vmul.f32 %v798_v55, %v143_v58 }
  0xd8   :  { %v145_v63 = vadd.f32 %v798_v55, %v144_v61 }
  0xda   :  { %v149_v2 = vsel %vm148_vm2, %v798_v55, %v145_v63 }
  0xdb   :  { %v154_v3 = vsel %vm151_vm3, %v153_v0, %v149_v2  ;;  %v336_v2 = vld [vmem:[#allocation7 + $0x170] sm:$0xff] }
  0xdc   :  { %v155_v4 = vmul.f32 %v154_v3, %v130_v1  ;;  %v337_v1 = vld [vmem:[#allocation7 + $0x178] sm:$0xff]  ;;  %v335_v3 = vld [vmem:[#allocation7 + $0x168] sm:$0xff] }
  0xdd   :  { %338 = vmatpush.msra.mxu3 %v337_v1  ;;  %v412_v1 = vld [vmem:[#allocation7 + $0x1c8] sm:$0xff] }
  0xde   :  { %v782_v5 = vclamps-f32 %v155_v4, 1.0  ;;  %v334_v4 = vld [vmem:[#allocation7 + $0x160] sm:$0xff] }
  0xdf   :  { %339 = vmatpush.msra.mxu3 %v336_v2 }
  0xe0   :  { %v158_v7 = vadd.f32 1.0, %v782_v5  ;;  %v333_v5 = vld [vmem:[#allocation7 + $0x158] sm:$0xff] }
  0xe1   :  { %340 = vmatpush.msra.mxu3 %v335_v3  ;;  %v411_v3 = vld [vmem:[#allocation7 + $0x1c0] sm:$0xff] }
  0xe2   :  { %v159_v8 = vmul.f32 %v158_v7, %v116_v6  ;;  %v332_v6 = vld [vmem:[#allocation7 + $0x150] sm:$0xff]  ;;  %v331_v7 = vld [vmem:[#allocation7 + $0x148] sm:$0xff] }
  0xe3   :  { %341 = vmatpush.msra.mxu3 %v334_v4 }
  0xe4   :  { %192 = vmatmul.f32.vlgmr.msra.gmra.mxu1 %v159_v8 }
  0xe5   :  { %342 = vmatpush.msra.mxu3 %v333_v5  ;;  %v410_v5 = vld [vmem:[#allocation7 + $0x1b8] sm:$0xff] }
  0xe7   :  { %343 = vmatpush.msra.mxu3 %v332_v6 }
  0xe9   :  { %344 = vmatpush.msra.mxu3 %v331_v7 }
  0xeb   :  { %345 = vmatpush.msra.mxu3 %v330_v10 }
  0xed   :  { %346 = vmatpush.msra.mxu3 %v329_v12 }
  0xef   :  { %347 = vmatpush.msra.mxu3 %v328_v14  ;;  %v407_v14 = vld [vmem:[#allocation7 + $0x1a0] sm:$0xff] }
 0x161   :  { %v193_v16 = vpop.f32.mrf.mxu1 }
 0x162   :  { %v197_v17 = vmul.f32 0.70710677, %v193_v16  ;;  %v196_v62 = vmul.f32 0.5, %v193_v16  ;;  %v327_v16 = vld [vmem:[#allocation7 + $0x128] sm:$0xff] }
 0x163   :  { %348 = vmatpush.msra.mxu3 %v327_v16  ;;  %v406_v16 = vld [vmem:[#allocation7 + $0x198] sm:$0xff] }
 0x164   :  { %v198_v19 = vmul.f32 %v197_v17, %v197_v17 }
 0x166   :  { %v199_v21 = vmin.f32 %v198_v19, 16.0  ;;  %v326_v19 = vld [vmem:[#allocation7 + $0x120] sm:$0xff] }
 0x167   :  { %349 = vmatpush.msra.mxu3 %v326_v19  ;;  %v405_v19 = vld [vmem:[#allocation7 + $0x190] sm:$0xff] }
 0x168   :  { %v200_v23 = vmul.f32 2.1237322e-06, %v199_v21  ;;  %v211_v25 = vmul.f32 3.8918573e-05, %v199_v21 }
 0x169   :  { %350 = vmatpush.msra.mxu3 %v325_v22 }
 0x16a   :  { %v201_v26 = vadd.f32 0.00028619796, %v200_v23  ;;  %v212_v28 = vadd.f32 0.001143296, %v211_v25 }
 0x16b   :  { %351 = vmatpush.msra.mxu3 %v324_v24 }
 0x16c   :  { %v202_v29 = vmul.f32 %v201_v26, %v199_v21  ;;  %v213_v31 = vmul.f32 %v212_v28, %v199_v21 }
 0x16d   :  { %352 = vmatpush.msra.mxu3 %v323_v27 }
 0x16e   :  { %v214_v33 = vadd.f32 0.014752088, %v213_v31  ;;  %v203_v34 = vadd.f32 0.0036580483, %v202_v29  ;;  %v322_v29 = vld [vmem:[#allocation7 + $0x100] sm:$0xff] }
 0x16f   :  { %353 = vmatpush.msra.mxu3 %v322_v29 }
 0x170   :  { %v215_v36 = vmul.f32 %v214_v33, %v199_v21  ;;  %v204_v39 = vmul.f32 %v203_v34, %v199_v21 }
 0x172   :  { %v216_v38 = vadd.f32 0.112945676, %v215_v36  ;;  %v205_v42 = vadd.f32 0.05243302, %v204_v39 }
 0x174   :  { %v217_v40 = vmul.f32 %v216_v38, %v199_v21  ;;  %v206_v45 = vmul.f32 %v205_v42, %v199_v21 }
 0x176   :  { %v218_v41 = vadd.f32 0.4994258, %v217_v40  ;;  %v207_v46 = vadd.f32 0.18741608, %v206_v45 }
 0x178   :  { %v219_v43 = vmul.f32 %v218_v41, %v199_v21  ;;  %v208_v48 = vmul.f32 %v207_v46, %v199_v21 }
 0x17a   :  { %v220_v44 = vadd.f32 1.0, %v219_v43  ;;  %v209_v52 = vadd.f32 1.1283791, %v208_v48 }
 0x17c   :  { %799 = vrcp.f32 %v220_v44  ;;  %v232_v51 = vand.u32 2147483648, %v220_v44  ;;  %v230_v54 = vand.u32 2147483647, %v220_v44  ;;  %vm226_vm5 = vweird.f32 %v220_v44 }
 0x17d   :  { %v210_v57 = vmul.f32 %v209_v52, %v197_v17 }
 0x17e   :  { %v233_v56 = vor.u32 1.1754944e-38, %v232_v51  ;;  %vm231_vm7 = vcmp.eq.f32.partialorder %v230_v54, 8.507059e+37 }
 0x182   :  { %v800_v47 = vpop.eup %799 }
 0x183   :  { %v222_v49 = vmul.f32 %v800_v47, %v220_v44  ;;  %vm227_vm4 = vweird.f32 %v800_v47 }
 0x184   :  { %vm228_vm6 = vmor %vm226_vm5, %vm227_vm4 }
 0x185   :  { %v223_v50 = vsub.f32 1.0, %v222_v49 }
 0x187   :  { %v224_v53 = vmul.f32 %v800_v47, %v223_v50 }
 0x189   :  { %v225_v55 = vadd.f32 %v800_v47, %v224_v53 }
 0x18b   :  { %v229_v58 = vsel %vm228_vm6, %v800_v47, %v225_v55 }
 0x18c   :  { %v234_v59 = vsel %vm231_vm7, %v233_v56, %v229_v58  ;;  %v417_v58 = vld [vmem:[#allocation7 + $0x1f0] sm:$0xff] }
 0x18d   :  { %v235_v60 = vmul.f32 %v234_v59, %v210_v57  ;;  %v418_v57 = vld [vmem:[#allocation7 + $0x1f8] sm:$0xff]  ;;  %v416_v59 = vld [vmem:[#allocation7 + $0x1e8] sm:$0xff] }
 0x18e   :  { %419 = vmatpush.msrb.mxu0 %v418_v57  ;;  %v493_v57 = vld [vmem:[#allocation7 + $0x248] sm:$0xff] }
 0x18f   :  { %v783_v61 = vclamps-f32 %v235_v60, 1.0  ;;  %v415_v60 = vld [vmem:[#allocation7 + $0x1e0] sm:$0xff] }
 0x190   :  { %420 = vmatpush.msrb.mxu0 %v417_v58 }
 0x191   :  { %v238_v63 = vadd.f32 1.0, %v783_v61  ;;  %v414_v61 = vld [vmem:[#allocation7 + $0x1d8] sm:$0xff] }
 0x192   :  { %421 = vmatpush.msrb.mxu0 %v416_v59  ;;  %v492_v59 = vld [vmem:[#allocation7 + $0x240] sm:$0xff] }
 0x193   :  { %v239_v0 = vmul.f32 %v238_v63, %v196_v62  ;;  %v413_v62 = vld [vmem:[#allocation7 + $0x1d0] sm:$0xff] }
 0x194   :  { %422 = vmatpush.msrb.mxu0 %v415_v60 }
 0x195   :  { %273 = vmatmul.f32.vlgmr.msra.gmra.mxu2 %v239_v0 }
 0x196   :  { %423 = vmatpush.msrb.mxu0 %v414_v61  ;;  %v491_v61 = vld [vmem:[#allocation7 + $0x238] sm:$0xff] }
 0x198   :  { %424 = vmatpush.msrb.mxu0 %v413_v62 }
 0x19a   :  { %425 = vmatpush.msrb.mxu0 %v412_v1 }
 0x19c   :  { %426 = vmatpush.msrb.mxu0 %v411_v3  ;;  %v489_v3 = vld [vmem:[#allocation7 + $0x228] sm:$0xff] }
 0x19e   :  { %427 = vmatpush.msrb.mxu0 %v410_v5 }
 0x218   :  { %v274_v8 = vpop.f32.mrf.mxu2 }
 0x219   :  { %v278_v9 = vmul.f32 0.70710677, %v274_v8  ;;  %v277_v54 = vmul.f32 0.5, %v274_v8  ;;  %v409_v8 = vld [vmem:[#allocation7 + $0x1b0] sm:$0xff] }
 0x21a   :  { %428 = vmatpush.msrb.mxu0 %v409_v8  ;;  %v487_v8 = vld [vmem:[#allocation7 + $0x218] sm:$0xff] }
 0x21b   :  { %v279_v11 = vmul.f32 %v278_v9, %v278_v9 }
 0x21d   :  { %v280_v13 = vmin.f32 %v279_v11, 16.0  ;;  %v408_v11 = vld [vmem:[#allocation7 + $0x1a8] sm:$0xff] }
 0x21e   :  { %429 = vmatpush.msrb.mxu0 %v408_v11  ;;  %v486_v11 = vld [vmem:[#allocation7 + $0x210] sm:$0xff] }
 0x21f   :  { %v281_v15 = vmul.f32 2.1237322e-06, %v280_v13  ;;  %v292_v17 = vmul.f32 3.8918573e-05, %v280_v13 }
 0x220   :  { %430 = vmatpush.msrb.mxu0 %v407_v14 }
 0x221   :  { %v282_v18 = vadd.f32 0.00028619796, %v281_v15  ;;  %v293_v20 = vadd.f32 0.001143296, %v292_v17 }
 0x222   :  { %431 = vmatpush.msrb.mxu0 %v406_v16 }
 0x223   :  { %v283_v21 = vmul.f32 %v282_v18, %v280_v13  ;;  %v294_v23 = vmul.f32 %v293_v20, %v280_v13 }
 0x224   :  { %432 = vmatpush.msrb.mxu0 %v405_v19 }
 0x225   :  { %v295_v25 = vadd.f32 0.014752088, %v294_v23  ;;  %v284_v26 = vadd.f32 0.0036580483, %v283_v21  ;;  %v404_v21 = vld [vmem:[#allocation7 + $0x188] sm:$0xff]  ;;  %v403_v23 = vld [vmem:[#allocation7 + $0x180] sm:$0xff] }
 0x226   :  { %433 = vmatpush.msrb.mxu0 %v404_v21 }
 0x227   :  { %v296_v28 = vmul.f32 %v295_v25, %v280_v13  ;;  %v285_v31 = vmul.f32 %v284_v26, %v280_v13 }
 0x228   :  { %434 = vmatpush.msrb.mxu0 %v403_v23 }
 0x229   :  { %v297_v30 = vadd.f32 0.112945676, %v296_v28  ;;  %v286_v34 = vadd.f32 0.05243302, %v285_v31 }
 0x22b   :  { %v298_v32 = vmul.f32 %v297_v30, %v280_v13  ;;  %v287_v37 = vmul.f32 %v286_v34, %v280_v13 }
 0x22d   :  { %v299_v33 = vadd.f32 0.4994258, %v298_v32  ;;  %v288_v38 = vadd.f32 0.18741608, %v287_v37 }
 0x22f   :  { %v300_v35 = vmul.f32 %v299_v33, %v280_v13  ;;  %v289_v40 = vmul.f32 %v288_v38, %v280_v13 }
 0x231   :  { %v301_v36 = vadd.f32 1.0, %v300_v35  ;;  %v290_v44 = vadd.f32 1.1283791, %v289_v40 }
 0x233   :  { %801 = vrcp.f32 %v301_v36  ;;  %v313_v43 = vand.u32 2147483648, %v301_v36  ;;  %v311_v46 = vand.u32 2147483647, %v301_v36  ;;  %vm307_vm9 = vweird.f32 %v301_v36 }
 0x234   :  { %v291_v49 = vmul.f32 %v290_v44, %v278_v9 }
 0x235   :  { %v314_v48 = vor.u32 1.1754944e-38, %v313_v43  ;;  %vm312_vm11 = vcmp.eq.f32.partialorder %v311_v46, 8.507059e+37 }
 0x239   :  { %v802_v39 = vpop.eup %801 }
 0x23a   :  { %v303_v41 = vmul.f32 %v802_v39, %v301_v36  ;;  %vm308_vm8 = vweird.f32 %v802_v39 }
 0x23b   :  { %vm309_vm10 = vmor %vm307_vm9, %vm308_vm8 }
 0x23c   :  { %v304_v42 = vsub.f32 1.0, %v303_v41 }
 0x23e   :  { %v305_v45 = vmul.f32 %v802_v39, %v304_v42 }
 0x240   :  { %v306_v47 = vadd.f32 %v802_v39, %v305_v45 }
 0x242   :  { %v310_v50 = vsel %vm309_vm10, %v802_v39, %v306_v47 }
 0x243   :  { %v315_v51 = vsel %vm312_vm11, %v314_v48, %v310_v50  ;;  %v498_v50 = vld [vmem:[#allocation7 + $0x270] sm:$0xff] }
 0x244   :  { %v316_v52 = vmul.f32 %v315_v51, %v291_v49  ;;  %v499_v49 = vld [vmem:[#allocation7 + $0x278] sm:$0xff]  ;;  %v497_v51 = vld [vmem:[#allocation7 + $0x268] sm:$0xff] }
 0x245   :  { %500 = vmatpush.msrb.mxu1 %v499_v49  ;;  %v574_v49 = vld [vmem:[#allocation7 + $0x2c8] sm:$0xff] }
 0x246   :  { %v784_v53 = vclamps-f32 %v316_v52, 1.0  ;;  %v496_v52 = vld [vmem:[#allocation7 + $0x260] sm:$0xff] }
 0x247   :  { %501 = vmatpush.msrb.mxu1 %v498_v50 }
 0x248   :  { %v319_v55 = vadd.f32 1.0, %v784_v53  ;;  %v495_v53 = vld [vmem:[#allocation7 + $0x258] sm:$0xff] }
 0x249   :  { %502 = vmatpush.msrb.mxu1 %v497_v51  ;;  %v573_v51 = vld [vmem:[#allocation7 + $0x2c0] sm:$0xff] }
 0x24a   :  { %v320_v56 = vmul.f32 %v319_v55, %v277_v54  ;;  %v494_v54 = vld [vmem:[#allocation7 + $0x250] sm:$0xff] }
 0x24b   :  { %503 = vmatpush.msrb.mxu1 %v496_v52 }
 0x24c   :  { %354 = vmatmul.f32.vlgmr.msra.gmra.mxu3 %v320_v56 }
 0x24d   :  { %504 = vmatpush.msrb.mxu1 %v495_v53  ;;  %v572_v53 = vld [vmem:[#allocation7 + $0x2b8] sm:$0xff] }
 0x24f   :  { %505 = vmatpush.msrb.mxu1 %v494_v54 }
 0x251   :  { %506 = vmatpush.msrb.mxu1 %v493_v57 }
 0x253   :  { %507 = vmatpush.msrb.mxu1 %v492_v59  ;;  %v570_v59 = vld [vmem:[#allocation7 + $0x2a8] sm:$0xff] }
 0x255   :  { %508 = vmatpush.msrb.mxu1 %v491_v61 }
 0x2cf   :  { %v355_v63 = vpop.f32.mrf.mxu3 }
 0x2d0   :  { %v359_v0 = vmul.f32 0.70710677, %v355_v63  ;;  %v358_v46 = vmul.f32 0.5, %v355_v63 }
 0x2d2   :  { %v360_v2 = vmul.f32 %v359_v0, %v359_v0 }
 0x2d4   :  { %v361_v4 = vmin.f32 %v360_v2, 16.0 }
 0x2d6   :  { %v362_v6 = vmul.f32 2.1237322e-06, %v361_v4  ;;  %v373_v7 = vmul.f32 3.8918573e-05, %v361_v4 }
 0x2d8   :  { %v363_v9 = vadd.f32 0.00028619796, %v362_v6  ;;  %v374_v10 = vadd.f32 0.001143296, %v373_v7  ;;  %v488_v6 = vld [vmem:[#allocation7 + $0x220] sm:$0xff] }
 0x2da   :  { %v364_v12 = vmul.f32 %v363_v9, %v361_v4  ;;  %v375_v13 = vmul.f32 %v374_v10, %v361_v4 }
 0x2dc   :  { %v376_v15 = vadd.f32 0.014752088, %v375_v13  ;;  %v365_v17 = vadd.f32 0.0036580483, %v364_v12  ;;  %v485_v13 = vld [vmem:[#allocation7 + $0x208] sm:$0xff] }
 0x2de   :  { %v377_v18 = vmul.f32 %v376_v15, %v361_v4  ;;  %v366_v22 = vmul.f32 %v365_v17, %v361_v4  ;;  %v484_v15 = vld [vmem:[#allocation7 + $0x200] sm:$0xff] }
 0x2e0   :  { %v378_v20 = vadd.f32 0.112945676, %v377_v18  ;;  %v367_v26 = vadd.f32 0.05243302, %v366_v22 }
 0x2e2   :  { %v379_v24 = vmul.f32 %v378_v20, %v361_v4  ;;  %v368_v29 = vmul.f32 %v367_v26, %v361_v4 }
 0x2e4   :  { %v380_v25 = vadd.f32 0.4994258, %v379_v24  ;;  %v369_v30 = vadd.f32 0.18741608, %v368_v29 }
 0x2e6   :  { %v381_v27 = vmul.f32 %v380_v25, %v361_v4  ;;  %v370_v32 = vmul.f32 %v369_v30, %v361_v4 }
 0x2e8   :  { %v382_v28 = vadd.f32 1.0, %v381_v27  ;;  %v371_v36 = vadd.f32 1.1283791, %v370_v32 }
 0x2ea   :  { %803 = vrcp.f32 %v382_v28  ;;  %v394_v35 = vand.u32 2147483648, %v382_v28  ;;  %v392_v38 = vand.u32 2147483647, %v382_v28  ;;  %vm388_vm13 = vweird.f32 %v382_v28 }
 0x2eb   :  { %v372_v41 = vmul.f32 %v371_v36, %v359_v0  ;;  %v490_v0 = vld [vmem:[#allocation7 + $0x230] sm:$0xff] }
 0x2ec   :  { %v395_v40 = vor.u32 1.1754944e-38, %v394_v35  ;;  %vm393_vm15 = vcmp.eq.f32.partialorder %v392_v38, 8.507059e+37  ;;  %509 = vmatpush.msrb.mxu1 %v490_v0  ;;  %v568_v0 = vld [vmem:[#allocation7 + $0x298] sm:$0xff] }
 0x2ee   :  { %510 = vmatpush.msrb.mxu1 %v489_v3  ;;  %v567_v3 = vld [vmem:[#allocation7 + $0x290] sm:$0xff] }
 0x2f0   :  { %v804_v31 = vpop.eup %803  ;;  %511 = vmatpush.msrb.mxu1 %v488_v6 }
 0x2f1   :  { %v384_v33 = vmul.f32 %v804_v31, %v382_v28  ;;  %vm389_vm12 = vweird.f32 %v804_v31 }
 0x2f2   :  { %vm390_vm14 = vmor %vm388_vm13, %vm389_vm12  ;;  %512 = vmatpush.msrb.mxu1 %v487_v8 }
 0x2f3   :  { %v385_v34 = vsub.f32 1.0, %v384_v33 }
 0x2f4   :  { %513 = vmatpush.msrb.mxu1 %v486_v11 }
 0x2f5   :  { %v386_v37 = vmul.f32 %v804_v31, %v385_v34 }
 0x2f6   :  { %514 = vmatpush.msrb.mxu1 %v485_v13 }
 0x2f7   :  { %v387_v39 = vadd.f32 %v804_v31, %v386_v37 }
 0x2f8   :  { %515 = vmatpush.msrb.mxu1 %v484_v15 }
 0x2f9   :  { %v391_v42 = vsel %vm390_vm14, %v804_v31, %v387_v39 }
 0x2fa   :  { %v396_v43 = vsel %vm393_vm15, %v395_v40, %v391_v42  ;;  %v579_v42 = vld [vmem:[#allocation7 + $0x2f0] sm:$0xff] }
 0x2fb   :  { %v397_v44 = vmul.f32 %v396_v43, %v372_v41  ;;  %v580_v41 = vld [vmem:[#allocation7 + $0x2f8] sm:$0xff]  ;;  %v578_v43 = vld [vmem:[#allocation7 + $0x2e8] sm:$0xff] }
 0x2fc   :  { %581 = vmatpush.msrb.mxu2 %v580_v41  ;;  %v655_v41 = vld [vmem:[#allocation7 + $0x348] sm:$0xff] }
 0x2fd   :  { %v785_v45 = vclamps-f32 %v397_v44, 1.0  ;;  %v577_v44 = vld [vmem:[#allocation7 + $0x2e0] sm:$0xff] }
 0x2fe   :  { %582 = vmatpush.msrb.mxu2 %v579_v42 }
 0x2ff   :  { %v400_v47 = vadd.f32 1.0, %v785_v45  ;;  %v576_v45 = vld [vmem:[#allocation7 + $0x2d8] sm:$0xff] }
 0x300   :  { %583 = vmatpush.msrb.mxu2 %v578_v43  ;;  %v654_v43 = vld [vmem:[#allocation7 + $0x340] sm:$0xff] }
 0x301   :  { %v401_v48 = vmul.f32 %v400_v47, %v358_v46  ;;  %v575_v46 = vld [vmem:[#allocation7 + $0x2d0] sm:$0xff] }
 0x302   :  { %584 = vmatpush.msrb.mxu2 %v577_v44 }
 0x303   :  { %435 = vmatmul.f32.vlgmr.msrb.gmra.mxu0 %v401_v48 }
 0x304   :  { %585 = vmatpush.msrb.mxu2 %v576_v45  ;;  %v653_v45 = vld [vmem:[#allocation7 + $0x338] sm:$0xff] }
 0x306   :  { %586 = vmatpush.msrb.mxu2 %v575_v46 }
 0x308   :  { %587 = vmatpush.msrb.mxu2 %v574_v49 }
 0x30a   :  { %588 = vmatpush.msrb.mxu2 %v573_v51  ;;  %v651_v51 = vld [vmem:[#allocation7 + $0x328] sm:$0xff] }
 0x30c   :  { %589 = vmatpush.msrb.mxu2 %v572_v53 }
 0x380   :  { %v436_v55 = vpop.f32.mrf.mxu0 }
 0x381   :  { %v440_v56 = vmul.f32 0.70710677, %v436_v55  ;;  %v439_v38 = vmul.f32 0.5, %v436_v55 }
 0x383   :  { %v441_v58 = vmul.f32 %v440_v56, %v440_v56 }
 0x385   :  { %v442_v60 = vmin.f32 %v441_v58, 16.0 }
 0x387   :  { %v443_v62 = vmul.f32 2.1237322e-06, %v442_v60  ;;  %v454_v63 = vmul.f32 3.8918573e-05, %v442_v60 }
 0x389   :  { %v444_v1 = vadd.f32 0.00028619796, %v443_v62  ;;  %v455_v2 = vadd.f32 0.001143296, %v454_v63  ;;  %v569_v62 = vld [vmem:[#allocation7 + $0x2a0] sm:$0xff] }
 0x38b   :  { %v445_v4 = vmul.f32 %v444_v1, %v442_v60  ;;  %v456_v5 = vmul.f32 %v455_v2, %v442_v60 }
 0x38d   :  { %v457_v7 = vadd.f32 0.014752088, %v456_v5  ;;  %v446_v9 = vadd.f32 0.0036580483, %v445_v4  ;;  %v566_v5 = vld [vmem:[#allocation7 + $0x288] sm:$0xff] }
 0x38f   :  { %v458_v10 = vmul.f32 %v457_v7, %v442_v60  ;;  %v447_v14 = vmul.f32 %v446_v9, %v442_v60  ;;  %v565_v7 = vld [vmem:[#allocation7 + $0x280] sm:$0xff] }
 0x391   :  { %v459_v12 = vadd.f32 0.112945676, %v458_v10  ;;  %v448_v18 = vadd.f32 0.05243302, %v447_v14 }
 0x393   :  { %v460_v16 = vmul.f32 %v459_v12, %v442_v60  ;;  %v449_v21 = vmul.f32 %v448_v18, %v442_v60 }
 0x395   :  { %v461_v17 = vadd.f32 0.4994258, %v460_v16  ;;  %v450_v22 = vadd.f32 0.18741608, %v449_v21 }
 0x397   :  { %v462_v19 = vmul.f32 %v461_v17, %v442_v60  ;;  %v451_v24 = vmul.f32 %v450_v22, %v442_v60 }
 0x399   :  { %v463_v20 = vadd.f32 1.0, %v462_v19  ;;  %v452_v28 = vadd.f32 1.1283791, %v451_v24 }
 0x39b   :  { %805 = vrcp.f32 %v463_v20  ;;  %v475_v27 = vand.u32 2147483648, %v463_v20  ;;  %v473_v30 = vand.u32 2147483647, %v463_v20  ;;  %vm469_vm1 = vweird.f32 %v463_v20 }
 0x39c   :  { %v453_v33 = vmul.f32 %v452_v28, %v440_v56  ;;  %v571_v56 = vld [vmem:[#allocation7 + $0x2b0] sm:$0xff] }
 0x39d   :  { %v476_v32 = vor.u32 1.1754944e-38, %v475_v27  ;;  %vm474_vm3 = vcmp.eq.f32.partialorder %v473_v30, 8.507059e+37  ;;  %590 = vmatpush.msrb.mxu2 %v571_v56  ;;  %v649_v56 = vld [vmem:[#allocation7 + $0x318] sm:$0xff] }
 0x39f   :  { %591 = vmatpush.msrb.mxu2 %v570_v59  ;;  %v648_v59 = vld [vmem:[#allocation7 + $0x310] sm:$0xff] }
 0x3a1   :  { %v806_v23 = vpop.eup %805  ;;  %592 = vmatpush.msrb.mxu2 %v569_v62 }
 0x3a2   :  { %v465_v25 = vmul.f32 %v806_v23, %v463_v20  ;;  %vm470_vm0 = vweird.f32 %v806_v23 }
 0x3a3   :  { %vm471_vm2 = vmor %vm469_vm1, %vm470_vm0  ;;  %593 = vmatpush.msrb.mxu2 %v568_v0 }
 0x3a4   :  { %v466_v26 = vsub.f32 1.0, %v465_v25 }
 0x3a5   :  { %594 = vmatpush.msrb.mxu2 %v567_v3 }
 0x3a6   :  { %v467_v29 = vmul.f32 %v806_v23, %v466_v26 }
 0x3a7   :  { %595 = vmatpush.msrb.mxu2 %v566_v5 }
 0x3a8   :  { %v468_v31 = vadd.f32 %v806_v23, %v467_v29 }
 0x3a9   :  { %596 = vmatpush.msrb.mxu2 %v565_v7 }
 0x3aa   :  { %v472_v34 = vsel %vm471_vm2, %v806_v23, %v468_v31 }
 0x3ab   :  { %v477_v35 = vsel %vm474_vm3, %v476_v32, %v472_v34  ;;  %v660_v34 = vld [vmem:[#allocation7 + $0x370] sm:$0xff] }
 0x3ac   :  { %v478_v36 = vmul.f32 %v477_v35, %v453_v33  ;;  %v661_v33 = vld [vmem:[#allocation7 + $0x378] sm:$0xff]  ;;  %v659_v35 = vld [vmem:[#allocation7 + $0x368] sm:$0xff] }
 0x3ad   :  { %662 = vmatpush.msrb.mxu3 %v661_v33  ;;  %v735_v33 = vld [vmem:[#allocation8 + $0x48] sm:$0xff] }
 0x3ae   :  { %v786_v37 = vclamps-f32 %v478_v36, 1.0  ;;  %v658_v36 = vld [vmem:[#allocation7 + $0x360] sm:$0xff] }
 0x3af   :  { %663 = vmatpush.msrb.mxu3 %v660_v34 }
 0x3b0   :  { %v481_v39 = vadd.f32 1.0, %v786_v37  ;;  %v657_v37 = vld [vmem:[#allocation7 + $0x358] sm:$0xff] }
 0x3b1   :  { %664 = vmatpush.msrb.mxu3 %v659_v35  ;;  %v734_v35 = vld [vmem:[#allocation8 + $0x40] sm:$0xff] }
 0x3b2   :  { %v482_v40 = vmul.f32 %v481_v39, %v439_v38  ;;  %v656_v38 = vld [vmem:[#allocation7 + $0x350] sm:$0xff] }
 0x3b3   :  { %665 = vmatpush.msrb.mxu3 %v658_v36 }
 0x3b4   :  { %516 = vmatmul.f32.vlgmr.msrb.gmra.mxu1 %v482_v40 }
 0x3b5   :  { %666 = vmatpush.msrb.mxu3 %v657_v37  ;;  %v733_v37 = vld [vmem:[#allocation8 + $0x38] sm:$0xff] }
 0x3b7   :  { %667 = vmatpush.msrb.mxu3 %v656_v38 }
 0x3b9   :  { %668 = vmatpush.msrb.mxu3 %v655_v41 }
 0x3bb   :  { %669 = vmatpush.msrb.mxu3 %v654_v43  ;;  %v731_v43 = vld [vmem:[#allocation8 + $0x28] sm:$0xff] }
 0x3bd   :  { %670 = vmatpush.msrb.mxu3 %v653_v45 }
 0x431   :  { %v517_v47 = vpop.f32.mrf.mxu1 }
 0x432   :  { %v521_v48 = vmul.f32 0.70710677, %v517_v47  ;;  %v520_v30 = vmul.f32 0.5, %v517_v47 }
 0x434   :  { %v522_v50 = vmul.f32 %v521_v48, %v521_v48 }
 0x436   :  { %v523_v52 = vmin.f32 %v522_v50, 16.0 }
 0x438   :  { %v524_v54 = vmul.f32 2.1237322e-06, %v523_v52  ;;  %v535_v55 = vmul.f32 3.8918573e-05, %v523_v52 }
 0x43a   :  { %v525_v57 = vadd.f32 0.00028619796, %v524_v54  ;;  %v536_v58 = vadd.f32 0.001143296, %v535_v55  ;;  %v650_v54 = vld [vmem:[#allocation7 + $0x320] sm:$0xff] }
 0x43c   :  { %v526_v60 = vmul.f32 %v525_v57, %v523_v52  ;;  %v537_v61 = vmul.f32 %v536_v58, %v523_v52 }
 0x43e   :  { %v538_v63 = vadd.f32 0.014752088, %v537_v61  ;;  %v527_v1 = vadd.f32 0.0036580483, %v526_v60  ;;  %v647_v61 = vld [vmem:[#allocation7 + $0x308] sm:$0xff] }
 0x440   :  { %v539_v2 = vmul.f32 %v538_v63, %v523_v52  ;;  %v528_v6 = vmul.f32 %v527_v1, %v523_v52  ;;  %v646_v63 = vld [vmem:[#allocation7 + $0x300] sm:$0xff] }
 0x442   :  { %v540_v4 = vadd.f32 0.112945676, %v539_v2  ;;  %v529_v10 = vadd.f32 0.05243302, %v528_v6 }
 0x444   :  { %v541_v8 = vmul.f32 %v540_v4, %v523_v52  ;;  %v530_v13 = vmul.f32 %v529_v10, %v523_v52 }
 0x446   :  { %v542_v9 = vadd.f32 0.4994258, %v541_v8  ;;  %v531_v14 = vadd.f32 0.18741608, %v530_v13 }
 0x448   :  { %v543_v11 = vmul.f32 %v542_v9, %v523_v52  ;;  %v532_v16 = vmul.f32 %v531_v14, %v523_v52 }
 0x44a   :  { %v544_v12 = vadd.f32 1.0, %v543_v11  ;;  %v533_v20 = vadd.f32 1.1283791, %v532_v16 }
 0x44c   :  { %807 = vrcp.f32 %v544_v12  ;;  %v556_v19 = vand.u32 2147483648, %v544_v12  ;;  %v554_v22 = vand.u32 2147483647, %v544_v12  ;;  %vm550_vm5 = vweird.f32 %v544_v12 }
 0x44d   :  { %v534_v25 = vmul.f32 %v533_v20, %v521_v48  ;;  %v652_v48 = vld [vmem:[#allocation7 + $0x330] sm:$0xff] }
 0x44e   :  { %v557_v24 = vor.u32 1.1754944e-38, %v556_v19  ;;  %vm555_vm7 = vcmp.eq.f32.partialorder %v554_v22, 8.507059e+37  ;;  %671 = vmatpush.msrb.mxu3 %v652_v48  ;;  %v729_v48 = vld [vmem:[#allocation8 + $0x18] sm:$0xff] }
 0x450   :  { %672 = vmatpush.msrb.mxu3 %v651_v51  ;;  %v728_v51 = vld [vmem:[#allocation8 + $0x10] sm:$0xff] }
 0x452   :  { %v808_v15 = vpop.eup %807  ;;  %673 = vmatpush.msrb.mxu3 %v650_v54 }
 0x453   :  { %v546_v17 = vmul.f32 %v808_v15, %v544_v12  ;;  %vm551_vm4 = vweird.f32 %v808_v15 }
 0x454   :  { %vm552_vm6 = vmor %vm550_vm5, %vm551_vm4  ;;  %674 = vmatpush.msrb.mxu3 %v649_v56 }
 0x455   :  { %v547_v18 = vsub.f32 1.0, %v546_v17 }
 0x456   :  { %675 = vmatpush.msrb.mxu3 %v648_v59 }
 0x457   :  { %v548_v21 = vmul.f32 %v808_v15, %v547_v18 }
 0x458   :  { %676 = vmatpush.msrb.mxu3 %v647_v61 }
 0x459   :  { %v549_v23 = vadd.f32 %v808_v15, %v548_v21 }
 0x45a   :  { %677 = vmatpush.msrb.mxu3 %v646_v63 }
 0x45b   :  { %v553_v26 = vsel %vm552_vm6, %v808_v15, %v549_v23 }
 0x45c   :  { %v558_v27 = vsel %vm555_vm7, %v557_v24, %v553_v26  ;;  %v740_v26 = vld [vmem:[#allocation8 + $0x70] sm:$0xff] }
 0x45d   :  { %v559_v28 = vmul.f32 %v558_v27, %v534_v25  ;;  %v741_v25 = vld [vmem:[#allocation8 + $0x78] sm:$0xff]  ;;  %v739_v27 = vld [vmem:[#allocation8 + $0x68] sm:$0xff] }
 0x45e   :  { %742 = vmatpush.msra.mxu0 %v741_v25 }
 0x45f   :  { %v787_v29 = vclamps-f32 %v559_v28, 1.0  ;;  %v738_v28 = vld [vmem:[#allocation8 + $0x60] sm:$0xff] }
 0x460   :  { %743 = vmatpush.msra.mxu0 %v740_v26 }
 0x461   :  { %v562_v31 = vadd.f32 1.0, %v787_v29  ;;  %v737_v29 = vld [vmem:[#allocation8 + $0x58] sm:$0xff] }
 0x462   :  { %744 = vmatpush.msra.mxu0 %v739_v27 }
 0x463   :  { %v563_v32 = vmul.f32 %v562_v31, %v520_v30  ;;  %v736_v30 = vld [vmem:[#allocation8 + $0x50] sm:$0xff] }
 0x464   :  { %745 = vmatpush.msra.mxu0 %v738_v28 }
 0x465   :  { %597 = vmatmul.f32.vlgmr.msrb.gmra.mxu2 %v563_v32 }
 0x466   :  { %746 = vmatpush.msra.mxu0 %v737_v29 }
 0x468   :  { %747 = vmatpush.msra.mxu0 %v736_v30 }
 0x46a   :  { %748 = vmatpush.msra.mxu0 %v735_v33 }
 0x46c   :  { %749 = vmatpush.msra.mxu0 %v734_v35 }
 0x46e   :  { %750 = vmatpush.msra.mxu0 %v733_v37 }
 0x4e8   :  { %v598_v39 = vpop.f32.mrf.mxu2 }
 0x4e9   :  { %v602_v40 = vmul.f32 0.70710677, %v598_v39  ;;  %v601_v22 = vmul.f32 0.5, %v598_v39 }
 0x4eb   :  { %v603_v42 = vmul.f32 %v602_v40, %v602_v40 }
 0x4ed   :  { %v604_v44 = vmin.f32 %v603_v42, 16.0 }
 0x4ef   :  { %v605_v46 = vmul.f32 2.1237322e-06, %v604_v44  ;;  %v616_v47 = vmul.f32 3.8918573e-05, %v604_v44 }
 0x4f1   :  { %v606_v49 = vadd.f32 0.00028619796, %v605_v46  ;;  %v617_v50 = vadd.f32 0.001143296, %v616_v47  ;;  %v730_v46 = vld [vmem:[#allocation8 + $0x20] sm:$0xff] }
 0x4f3   :  { %v607_v52 = vmul.f32 %v606_v49, %v604_v44  ;;  %v618_v53 = vmul.f32 %v617_v50, %v604_v44 }
 0x4f5   :  { %v619_v55 = vadd.f32 0.014752088, %v618_v53  ;;  %v608_v57 = vadd.f32 0.0036580483, %v607_v52  ;;  %v727_v53 = vld [vmem:[#allocation8 + $0x8] sm:$0xff] }
 0x4f7   :  { %v620_v58 = vmul.f32 %v619_v55, %v604_v44  ;;  %v609_v62 = vmul.f32 %v608_v57, %v604_v44  ;;  %v726_v55 = vld [vmem:[#allocation8] sm:$0xff] }
 0x4f9   :  { %v621_v60 = vadd.f32 0.112945676, %v620_v58  ;;  %v610_v2 = vadd.f32 0.05243302, %v609_v62 }
 0x4fb   :  { %v622_v0 = vmul.f32 %v621_v60, %v604_v44  ;;  %v611_v5 = vmul.f32 %v610_v2, %v604_v44 }
 0x4fd   :  { %v623_v1 = vadd.f32 0.4994258, %v622_v0  ;;  %v612_v6 = vadd.f32 0.18741608, %v611_v5 }
 0x4ff   :  { %v624_v3 = vmul.f32 %v623_v1, %v604_v44  ;;  %v613_v8 = vmul.f32 %v612_v6, %v604_v44 }
 0x501   :  { %v625_v4 = vadd.f32 1.0, %v624_v3  ;;  %v614_v12 = vadd.f32 1.1283791, %v613_v8 }
 0x503   :  { %809 = vrcp.f32 %v625_v4  ;;  %v637_v11 = vand.u32 2147483648, %v625_v4  ;;  %v635_v14 = vand.u32 2147483647, %v625_v4  ;;  %vm631_vm9 = vweird.f32 %v625_v4 }
 0x504   :  { %v615_v17 = vmul.f32 %v614_v12, %v602_v40  ;;  %v732_v40 = vld [vmem:[#allocation8 + $0x30] sm:$0xff] }
 0x505   :  { %v638_v16 = vor.u32 1.1754944e-38, %v637_v11  ;;  %vm636_vm11 = vcmp.eq.f32.partialorder %v635_v14, 8.507059e+37  ;;  %751 = vmatpush.msra.mxu0 %v732_v40 }
 0x507   :  { %752 = vmatpush.msra.mxu0 %v731_v43 }
 0x509   :  { %v810_v7 = vpop.eup %809  ;;  %753 = vmatpush.msra.mxu0 %v730_v46 }
 0x50a   :  { %v627_v9 = vmul.f32 %v810_v7, %v625_v4  ;;  %vm632_vm8 = vweird.f32 %v810_v7 }
 0x50b   :  { %vm633_vm10 = vmor %vm631_vm9, %vm632_vm8  ;;  %754 = vmatpush.msra.mxu0 %v729_v48 }
 0x50c   :  { %v628_v10 = vsub.f32 1.0, %v627_v9 }
 0x50d   :  { %755 = vmatpush.msra.mxu0 %v728_v51 }
 0x50e   :  { %v629_v13 = vmul.f32 %v810_v7, %v628_v10 }
 0x50f   :  { %756 = vmatpush.msra.mxu0 %v727_v53 }
 0x510   :  { %v630_v15 = vadd.f32 %v810_v7, %v629_v13 }
 0x511   :  { %757 = vmatpush.msra.mxu0 %v726_v55 }
 0x512   :  { %v634_v18 = vsel %vm633_vm10, %v810_v7, %v630_v15 }
 0x513   :  { %v639_v19 = vsel %vm636_vm11, %v638_v16, %v634_v18 }
 0x514   :  { %v640_v20 = vmul.f32 %v639_v19, %v615_v17 }
 0x516   :  { %v788_v21 = vclamps-f32 %v640_v20, 1.0 }
 0x518   :  { %v643_v23 = vadd.f32 1.0, %v788_v21 }
 0x51a   :  { %v644_v24 = vmul.f32 %v643_v23, %v601_v22 }
 0x51c   :  { %678 = vmatmul.f32.vlgmr.msrb.gmra.mxu3 %v644_v24 }
 0x59f   :  { %v679_v31 = vpop.f32.mrf.mxu3 }
 0x5a0   :  { %v683_v32 = vmul.f32 0.70710677, %v679_v31  ;;  %v682_v14 = vmul.f32 0.5, %v679_v31 }
 0x5a2   :  { %v684_v34 = vmul.f32 %v683_v32, %v683_v32 }
 0x5a4   :  { %v685_v36 = vmin.f32 %v684_v34, 16.0 }
 0x5a6   :  { %v686_v38 = vmul.f32 2.1237322e-06, %v685_v36  ;;  %v697_v39 = vmul.f32 3.8918573e-05, %v685_v36 }
 0x5a8   :  { %v687_v41 = vadd.f32 0.00028619796, %v686_v38  ;;  %v698_v42 = vadd.f32 0.001143296, %v697_v39 }
 0x5aa   :  { %v688_v44 = vmul.f32 %v687_v41, %v685_v36  ;;  %v699_v45 = vmul.f32 %v698_v42, %v685_v36 }
 0x5ac   :  { %v700_v47 = vadd.f32 0.014752088, %v699_v45  ;;  %v689_v49 = vadd.f32 0.0036580483, %v688_v44 }
 0x5ae   :  { %v701_v50 = vmul.f32 %v700_v47, %v685_v36  ;;  %v690_v54 = vmul.f32 %v689_v49, %v685_v36 }
 0x5b0   :  { %v702_v52 = vadd.f32 0.112945676, %v701_v50  ;;  %v691_v58 = vadd.f32 0.05243302, %v690_v54 }
 0x5b2   :  { %v703_v56 = vmul.f32 %v702_v52, %v685_v36  ;;  %v692_v61 = vmul.f32 %v691_v58, %v685_v36 }
 0x5b4   :  { %v704_v57 = vadd.f32 0.4994258, %v703_v56  ;;  %v693_v62 = vadd.f32 0.18741608, %v692_v61 }
 0x5b6   :  { %v705_v59 = vmul.f32 %v704_v57, %v685_v36  ;;  %v694_v0 = vmul.f32 %v693_v62, %v685_v36 }
 0x5b8   :  { %v706_v60 = vadd.f32 1.0, %v705_v59  ;;  %v695_v4 = vadd.f32 1.1283791, %v694_v0 }
 0x5ba   :  { %811 = vrcp.f32 %v706_v60  ;;  %v718_v3 = vand.u32 2147483648, %v706_v60  ;;  %v716_v6 = vand.u32 2147483647, %v706_v60  ;;  %vm712_vm13 = vweird.f32 %v706_v60 }
 0x5bb   :  { %v696_v9 = vmul.f32 %v695_v4, %v683_v32 }
 0x5bc   :  { %v719_v8 = vor.u32 1.1754944e-38, %v718_v3  ;;  %vm717_vm15 = vcmp.eq.f32.partialorder %v716_v6, 8.507059e+37 }
 0x5c0   :  { %v812_v63 = vpop.eup %811 }
 0x5c1   :  { %v708_v1 = vmul.f32 %v812_v63, %v706_v60  ;;  %vm713_vm12 = vweird.f32 %v812_v63 }
 0x5c2   :  { %vm714_vm14 = vmor %vm712_vm13, %vm713_vm12 }
 0x5c3   :  { %v709_v2 = vsub.f32 1.0, %v708_v1 }
 0x5c5   :  { %v710_v5 = vmul.f32 %v812_v63, %v709_v2 }
 0x5c7   :  { %v711_v7 = vadd.f32 %v812_v63, %v710_v5 }
 0x5c9   :  { %v715_v10 = vsel %vm714_vm14, %v812_v63, %v711_v7 }
 0x5ca   :  { %v720_v11 = vsel %vm717_vm15, %v719_v8, %v715_v10 }
 0x5cb   :  { %v721_v12 = vmul.f32 %v720_v11, %v696_v9 }
 0x5cd   :  { %v789_v13 = vclamps-f32 %v721_v12, 1.0 }
 0x5cf   :  { %v724_v15 = vadd.f32 1.0, %v789_v13 }
 0x5d1   :  { %v725_v16 = vmul.f32 %v724_v15, %v682_v14 }
 0x5d3   :  { %758 = vmatmul.f32.vlgmr.msra.gmra.mxu0 %v725_v16 }
 0x650   :  { %v759_v17 = vpop.f32.mrf.mxu0 }
 0x651   :  { %762 = vst [vmem:[#allocation10] sm:$0xff] %v759_v17 }
 0x652   :  { %773 = dma.vmem_to_hbm [thread:$0]  %s769_s3, 128, %s771_s11, [#allocation4]  }
 0x653   :  { %939 = dma.done.wait [#allocation4], 128  }
 0x654   :  { %940 = vsyncadd [#allocation4], 4294967168 }
 0x655   :  { %778 = vsyncpa [#allocation3], 1 }
 0x656   :  { %779 = vsyncpa [#allocation6], 1 }
 0x657   :  { %780 = vsyncpa [#allocation9], 1 }
 0x658   :  { %781 = vsyncpa [#allocation4], 1 }

</bundles_post_ra>
